<compile_context>
chip_gen: v7x
topology: tpu7x:2x2x1
jax: 0.10.0
libtpu: 0.0.40
codegen_flags: <defaults>
</compile_context>

<pallas_src>
import math

import jax
import jax.numpy as jnp
from jax.experimental import pallas as pl
from jax.experimental.pallas import tpu as pltpu


def _cad_kernel(e_ref, c2_ref, cn_ref, o_ref):
    # e_ref : (mt, C)  embeds tile (patches on sublanes, C full-extent on lanes)
    # c2_ref: (P, C)   -2 * centroids (compute dtype)
    # cn_ref: (P, 1)   precomputed ||centroid_p||^2, f32
    # o_ref : (1, mt)  min distance per patch (lane-dense store)
    e = e_ref[...]                                               # (mt, C)
    c2 = c2_ref[...]                                             # (P, C)
    cn = cn_ref[...]                                             # (P, 1) f32

    # -2 * (c_p . e_m) for every prototype / patch.  Contracting C on both
    # operands (A @ B^T form) keeps P on sublanes and the patch axis on the
    # 128-lane axis: (P, mt).  The small (mt, C) rhs transpose happens in VMEM.
    s = jax.lax.dot_general(
        c2, e, dimension_numbers=(((1,), (1,)), ((), ())),
        preferred_element_type=jnp.float32)                      # (P, mt)

    # min_p (||c_p||^2 - 2 c_p.e_m): squared distance minus the per-patch
    # constant term, which is added back after the min.
    m = jnp.min(cn + s, axis=0, keepdims=True)                   # (1, mt)

    # ||e_m||^2 in the same (1, mt) layout via a tiny ones-row matmul with f32
    # accumulation (avoids any in-kernel relayout of a sublane-oriented sum).
    ef = e.astype(jnp.float32)
    ones_row = jnp.ones((1, ef.shape[1]), jnp.float32)
    feats = jax.lax.dot_general(
        ones_row, ef * ef, dimension_numbers=(((1,), (1,)), ((), ())),
        preferred_element_type=jnp.float32)                      # (1, mt)

    d2 = feats + m                                               # (1, mt)
    # Clamp: floating-point cancellation can push d2 slightly negative -> NaN.
    o_ref[...] = jnp.sqrt(jnp.maximum(d2, 0.0))


def _choose_tile(m, c, itemsize):
    """Lane-dense (multiple-of-128) tile along the fused patch axis M.

    Grows the tile (128 -> 1024) only while (a) at least ~8 grid steps remain,
    so the BlockSpec pipeline overlaps DMA with compute and the grid always has
    >= 2 steps once m > 128 (megacore sharding on v7x), and (b) the
    double-buffered embeds tile (lanes padded to >=128) stays under ~8 MiB,
    which is safe even for v5e's 16 MiB scoped-VMEM default.
    """
    vmem_budget = 8 * 1024 * 1024
    mt = 128
    while (mt < 1024
           and 8 * mt < m
           and 2 * (2 * mt) * max(c, 128) * itemsize <= vmem_budget):
        mt *= 2
    return mt


def cad_coarse_grained_forward(embeds, centroids, fp_nums, *,
                               compute_dtype=jnp.bfloat16):
    """embeds: (B, N, C), centroids: (P, C).

    Returns (loss, score) with loss = 0.0 (eval mode) and score of shape
    (B, 1, H, W) with H = W = sqrt(fp_nums).
    """
    B, N, C = embeds.shape
    P, C2 = centroids.shape
    assert C == C2 and N == fp_nums
    h = int(math.sqrt(fp_nums))
    assert h * h == fp_nums
    # The "softmin of a single element == 1" shortcut only holds for K + J == 1
    # (module defaults: K=1, J=0).
    K, J = 1, 0
    assert K + J == 1

    M = B * N
    itemsize = jnp.dtype(compute_dtype).itemsize
    mt = _choose_tile(M, C, itemsize)
    m_pad = mt * pl.cdiv(M, mt)
    grid = (m_pad // mt,)

    # Flattened patches in their natural (M, C) layout, quantized to the
    # compute dtype; zero-pad M to a whole number of tiles (padded lanes are
    # sliced off below).  No HBM transpose.
    e2d = embeds.reshape(M, C).astype(compute_dtype)
    if m_pad != M:
        e2d = jnp.pad(e2d, ((0, m_pad - M), (0, 0)))

    # Tiny prototype-side precompute, hoisted out of the kernel.  The -2 factor
    # is folded into the small centroid operand (exact scaling by a power of 2).
    cq = centroids.astype(compute_dtype)
    c2 = (-2.0 * cq.astype(jnp.float32)).astype(compute_dtype)            # (P, C)
    centers = jnp.sum(jnp.square(cq.astype(jnp.float32)), axis=-1,
                      keepdims=True)                                       # (P, 1)

    cost = pl.CostEstimate(
        flops=2 * (P + 1) * C * m_pad,
        transcendentals=0,
        bytes_accessed=(m_pad * C * itemsize          # embeds stream (dominant)
                        + P * C * itemsize + P * 4    # centroids + norms
                        + m_pad * 4))                 # output

    min_dist = pl.pallas_call(
        _cad_kernel,
        out_shape=jax.ShapeDtypeStruct((1, m_pad), jnp.float32),
        grid_spec=pltpu.PrefetchScalarGridSpec(
            num_scalar_prefetch=0,
            grid=grid,
            in_specs=[
                pl.BlockSpec((mt, C), lambda i: (i, 0)),
                pl.BlockSpec((P, C), lambda i: (0, 0)),
                pl.BlockSpec((P, 1), lambda i: (0, 0)),
            ],
            out_specs=pl.BlockSpec((1, mt), lambda i: (0, i)),
        ),
        compiler_params=pltpu.CompilerParams(
            dimension_semantics=("parallel",)),
        cost_estimate=cost,
    )(e2d, c2, centers)

    # 'b (h w) 1 -> b 1 h w'
    score = min_dist[0, :M].reshape(B, h, h)[:, None, :, :]
    loss = jnp.float32(0.0)
    return loss, score


def _reference(embeds, centroids):
    # Pure-JAX reference mirroring the PyTorch forward (eval mode), with the
    # same sqrt(max(., 0)) clamp the kernel uses (PyTorch would emit NaN on
    # tiny negative cancellation).
    features = jnp.sum(embeds ** 2, axis=2, keepdims=True)
    centers = jnp.sum(centroids ** 2, axis=-1)[None, None, :]
    f_c = 2.0 * jnp.einsum('bnc,pc->bnp', embeds, centroids,
                           precision=jax.lax.Precision.HIGHEST)
    dist = jnp.sqrt(jnp.maximum(features + centers - f_c, 0.0))
    d0 = jnp.min(dist, axis=-1)          # topk(1, largest=False).values[..., 0]
    return 1.0 * d0                      # softmin of a single element == 1


if __name__ == "__main__":
    # Small shapes consistent with the module:
    #   args.fp_nums = 64 (=> 8x8 spatial), args.out_dim = 32, nmb_protypes = 16
    B, H, W, C, P = 2, 8, 8, 32, 16
    fp_nums = H * W

    key = jax.random.PRNGKey(0)
    k_e, k_c = jax.random.split(key)
    embeds = jax.random.normal(k_e, (B, fp_nums, C), dtype=jnp.float32)
    # Deterministic centroids mimicking init_banks(norm_type='randn', p=2,
    # norm=1): L2-normalized gaussian prototypes.
    raw = jax.random.normal(k_c, (P, C), dtype=jnp.float32)
    centroids = raw / jnp.linalg.norm(raw, axis=-1, keepdims=True)

    # Tolerance note: distances are O(5); 3e-2 abs (~0.5% rel) comfortably
    # covers MXU accumulation-order differences and any reduced-precision
    # lowering of the tiny f32 ||e||^2 matmul, while the bf16-vs-f32 check
    # additionally absorbs input quantization error.
    def check(e, c, b, compute_dtype, atol):
        loss, score = cad_coarse_grained_forward(e, c, fp_nums,
                                                 compute_dtype=compute_dtype)
        jax.block_until_ready(score)
        assert score.shape == (b, 1, H, W), score.shape
        assert float(loss) == 0.0
        eq = e.astype(compute_dtype).astype(jnp.float32)
        cq = c.astype(compute_dtype).astype(jnp.float32)
        ref = _reference(eq, cq).reshape(b, H, W)[:, None, :, :]
        err = float(jnp.max(jnp.abs(score - ref)))
        assert err < atol, err
        return score

    # f32 compute path: matches the f32 reference.
    check(embeds, centroids, B, jnp.float32, 3e-2)

    # bf16 compute path (default): matches the reference at the same input
    # precision, and stays close to the full-f32 reference.
    score = check(embeds, centroids, B, jnp.bfloat16, 3e-2)
    ref32 = _reference(embeds, centroids).reshape(B, H, W)[:, None, :, :]
    assert float(jnp.max(jnp.abs(score - ref32))) < 8e-2

    # Odd batch exercises the M-padding / multi-step-grid path (M=192 -> 256,
    # grid=(2,), shards across both TensorCores on v7x).
    embeds3 = jax.random.normal(key, (3, fp_nums, C), dtype=jnp.float32)
    check(embeds3, centroids, 3, jnp.bfloat16, 3e-2)

    print("KERNEL_OK")
</pallas_src>

<mosaic_0001>
module attributes {stable_mosaic.version = 11 : i64} {
  func.func @_cad_kernel(%arg0: i32, %arg1: memref<128x32xf32, #tpu.memory_space<vmem>>, %arg2: memref<16x32xf32, #tpu.memory_space<vmem>>, %arg3: memref<16x1xf32, #tpu.memory_space<vmem>>, %arg4: memref<1x128xf32, #tpu.memory_space<vmem>>) attributes {dimension_semantics = [#tpu.dimension_semantics<parallel>], iteration_bounds = array<i64: 1>, scalar_prefetch = 0 : i64, scratch_operands = 0 : i64, tpu.core_type = #tpu.core_type<tc>, window_params = [{transform_indices = @transform_0, window_bounds = array<i64: 128, 32>}, {pipeline_mode = #tpu.pipeline_mode<synchronous>, transform_indices = @transform_1, window_bounds = array<i64: 16, 32>}, {pipeline_mode = #tpu.pipeline_mode<synchronous>, transform_indices = @transform_2, window_bounds = array<i64: 16, 1>}, {transform_indices = @transform_3, window_bounds = array<i64: 1, 128>}]} {
    %c0 = arith.constant 0 : index
    %c0_0 = arith.constant 0 : index
    %0 = vector.load %arg1[%c0, %c0_0] : memref<128x32xf32, #tpu.memory_space<vmem>>, vector<128x32xf32>
    %c0_1 = arith.constant 0 : index
    %c0_2 = arith.constant 0 : index
    %1 = vector.load %arg2[%c0_1, %c0_2] : memref<16x32xf32, #tpu.memory_space<vmem>>, vector<16x32xf32>
    %c0_3 = arith.constant 0 : index
    %c0_4 = arith.constant 0 : index
    %2 = vector.load %arg3[%c0_3, %c0_4] : memref<16x1xf32, #tpu.memory_space<vmem>>, vector<16x1xf32>
    %cst = arith.constant dense<0.000000e+00> : vector<16x128xf32>
    %3 = tpu.matmul %1, %0, %cst {dimension_numbers = #tpu.dot_dimension_numbers<[1], [1], [0], [0], [0, 0, 1, 0], [], []>} : vector<16x32xf32>, vector<128x32xf32>, vector<16x128xf32> -> vector<16x128xf32>
    %4 = vector.broadcast %2 : vector<16x1xf32> to vector<16x128xf32>
    %5 = arith.addf %4, %3 : vector<16x128xf32>
    %cst_5 = arith.constant dense<0x7F800000> : vector<128xf32>
    %6 = vector.multi_reduction <minimumf>, %5, %cst_5 [0] : vector<16x128xf32> to vector<128xf32>
    %7 = vector.shape_cast %6 : vector<128xf32> to vector<1x128xf32>
    %cst_6 = arith.constant 1.000000e+00 : f32
    %8 = vector.broadcast %cst_6 : f32 to vector<1x32xf32>
    %9 = arith.mulf %0, %0 : vector<128x32xf32>
    %cst_7 = arith.constant dense<0.000000e+00> : vector<1x128xf32>
    %10 = tpu.matmul %8, %9, %cst_7 {dimension_numbers = #tpu.dot_dimension_numbers<[1], [1], [0], [0], [0, 0, 1, 0], [], []>} : vector<1x32xf32>, vector<128x32xf32>, vector<1x128xf32> -> vector<1x128xf32>
    %11 = arith.addf %10, %7 : vector<1x128xf32>
    %cst_8 = arith.constant 0.000000e+00 : f32
    %12 = vector.broadcast %cst_8 : f32 to vector<1x128xf32>
    %13 = arith.maximumf %11, %12 : vector<1x128xf32>
    %14 = math.sqrt %13 : vector<1x128xf32>
    %c0_9 = arith.constant 0 : index
    %c0_10 = arith.constant 0 : index
    %15 = vector.load %arg4[%c0_9, %c0_10] : memref<1x128xf32, #tpu.memory_space<vmem>>, vector<1x128xf32>
    tpu.vector_store %arg4[%c0_9, %c0_10], %14 {strides = array<i32>} : memref<1x128xf32, #tpu.memory_space<vmem>>, vector<1x128xf32>,
    return
  }
  func.func @transform_0(%arg0: i32) -> (i32, i32) {
    %c0_i32 = arith.constant 0 : i32
    %c0_i32_0 = arith.constant 0 : i32
    return %arg0, %c0_i32 : i32, i32
  }
  func.func @transform_1(%arg0: i32) -> (i32, i32) {
    %c0_i32 = arith.constant 0 : i32
    %c0_i32_0 = arith.constant 0 : i32
    %c0_i32_1 = arith.constant 0 : i32
    return %c0_i32, %c0_i32_0 : i32, i32
  }
  func.func @transform_2(%arg0: i32) -> (i32, i32) {
    %c0_i32 = arith.constant 0 : i32
    %c0_i32_0 = arith.constant 0 : i32
    %c0_i32_1 = arith.constant 0 : i32
    return %c0_i32, %c0_i32_0 : i32, i32
  }
  func.func @transform_3(%arg0: i32) -> (i32, i32) {
    %c0_i32 = arith.constant 0 : i32
    %c0_i32_0 = arith.constant 0 : i32
    return %c0_i32, %arg0 : i32, i32
  }
}

</mosaic_0001>

<bundles_post_ra>
// kernel: tpu_custom_call.1
= control target key start
LH: loop header
LB: loop body
LE: loop exit
PB: predicated region body
PF: predicated region fallthrough
CT: control target
= control target key end

     0   :  { %vm35_vm0 = vcmask 261120   ;;  %v597_v8 = vmov 0.0|0.0   ;;  %s760_s0 = inlined_call_operand.vmem [shape: f32[128,32], index: 0, kind: input, shape index: {}]   ;;  %s761_s1 = inlined_call_operand.vmem [shape: f32[16,32], index: 1, kind: input, shape index: {}]   ;;  %s762_s2 = inlined_call_operand.vmem [shape: f32[16,1], index: 2, kind: input, shape index: {}]   ;;  %s763_s3 = inlined_call_operand.hbm [shape: f32[1,128], index: 3, kind: output, shape index: {}]  }
   0x1   :  { %v15_v0 = vld [vmem:[%s760_s0] sm:$0xff]  ;;  %v16_v1 = vld [vmem:[%s760_s0 + $0x8] sm:$0xff]  ;;  %v17_v2 = vld [vmem:[%s760_s0 + $0x10] sm:$0xff]  ;;  %532 = vmatprep.subr.bf16.mxu1 %v597_v8 }
   0x2   :  { %v484_v3 = vpack.c.bf16 %v16_v1, %v15_v0  ;;  %vm634_vm1 = vmpackc.low %vm35_vm0, %vm35_vm0  ;;  %v184_v5 = vmul.f32 %v15_v0, %v15_v0  ;;  %v185_v6 = vmul.f32 %v16_v1, %v16_v1  ;;  %v18_v7 = vld [vmem:[%s760_s0 + $0x18] sm:$0xff]  ;;  %v186_v11 = vmul.f32 %v17_v2, %v17_v2  ;;  %v31_v13 = vld [vmem:[%s761_s1] sm:$0xff] }
   0x3   :  { %v490_v9 = vpack.c.bf16 %v18_v7, %v17_v2  ;;  %v187_v12 = vmul.f32 %v18_v7, %v18_v7  ;;  %v19_v14 = vld [vmem:[%s760_s0 + $0x20] sm:$0xff]  ;;  %v20_v15 = vld [vmem:[%s760_s0 + $0x28] sm:$0xff]  ;;  %446 = vmatprep.mubr.msk.f32.mxu0 %vm35_vm0, %v31_v13 }
   0x4   :  { %486 = vmatprep.subr.msk.bf16.mxu0 %vm634_vm1, %v484_v3  ;;  %v533_v10 = vpack.c.bf16 %v185_v6, %v184_v5  ;;  %v33_v16 = vld [vmem:[%s762_s2] sm:$0xff] }
   0x5   :  { %489 = vmatpush3.bf16.xpose.msk.msra.mxu0 %vm634_vm1, %v484_v3 }
   0x6   :  { %492 = vmatprep.subr.msk.bf16.mxu0 %vm634_vm1, %v490_v9  ;;  %535 = vmatpush3.bf16.xpose.msk.msra.mxu1 %vm634_vm1, %v533_v10 }
   0x7   :  { %536 = vmatprep.subr.bf16.mxu1 %v597_v8 }
   0x8   :  { %8 = vsyncpa [#allocation3], 0  ;;  %vm598_vm2 = vmmov 0   ;;  %v599_v17 = vmov 0.0   ;;  %v496_v18 = vpack.c.bf16 %v20_v15, %v19_v14  ;;  %v537_v19 = vpack.c.bf16 %v187_v12, %v186_v11  ;;  %v34_v21 = vld [vmem:[%s762_s2 + $0x8] sm:$0xff]  ;;  %v21_v24 = vld [vmem:[%s760_s0 + $0x30] sm:$0xff] }
   0x9   :  { %481 = vmatprep.mubr.msk.f32.mxu1 %vm598_vm2, %v599_v17  ;;  %v600_v20 = vmov 0   ;;  %v188_v22 = vmul.f32 %v19_v14, %v19_v14  ;;  %v189_v23 = vmul.f32 %v20_v15, %v20_v15  ;;  %v22_v25 = vld [vmem:[%s760_s0 + $0x38] sm:$0xff]  ;;  %v190_v28 = vmul.f32 %v21_v24, %v21_v24  ;;  %v23_v30 = vld [vmem:[%s760_s0 + $0x40] sm:$0xff]  ;;  %v24_v31 = vld [vmem:[%s760_s0 + $0x48] sm:$0xff] }
   0xa   :  { %570 = vset.pattern.permute.xlu0 %v600_v20  ;;  %v502_v26 = vpack.c.bf16 %v22_v25, %v21_v24  ;;  %v191_v29 = vmul.f32 %v22_v25, %v22_v25  ;;  %v508_v32 = vpack.c.bf16 %v24_v31, %v23_v30  ;;  %v192_v34 = vmul.f32 %v23_v30, %v23_v30  ;;  %v25_v36 = vld [vmem:[%s760_s0 + $0x50] sm:$0xff]  ;;  %v26_v37 = vld [vmem:[%s760_s0 + $0x58] sm:$0xff]  ;;  %v27_v42 = vld [vmem:[%s760_s0 + $0x60] sm:$0xff] }
   0xb   :  { %167 = vperm.xlu0 %570, %v33_v16   ;;  %v541_v27 = vpack.c.bf16 %v189_v23, %v188_v22  ;;  %v193_v35 = vmul.f32 %v24_v31, %v24_v31  ;;  %v514_v38 = vpack.c.bf16 %v26_v37, %v25_v36  ;;  %v194_v40 = vmul.f32 %v25_v36, %v25_v36  ;;  %v28_v43 = vld [vmem:[%s760_s0 + $0x68] sm:$0xff]  ;;  %v29_v48 = vld [vmem:[%s760_s0 + $0x70] sm:$0xff]  ;;  %v30_v49 = vld [vmem:[%s760_s0 + $0x78] sm:$0xff] }
   0xc   :  { %v545_v33 = vpack.c.bf16 %v191_v29, %v190_v28  ;;  %v195_v41 = vmul.f32 %v26_v37, %v26_v37  ;;  %v520_v44 = vpack.c.bf16 %v28_v43, %v27_v42  ;;  %v196_v46 = vmul.f32 %v27_v42, %v27_v42  ;;  %v32_v55 = vld [vmem:[%s761_s1 + $0x8] sm:$0xff]  ;;  %s602_s1 = smov [#allocation2]  }
   0xd   :  { %495 = vmatpush3.bf16.xpose.msk.msra.mxu0 %vm634_vm1, %v490_v9  ;;  %v549_v39 = vpack.c.bf16 %v193_v35, %v192_v34  ;;  %v197_v47 = vmul.f32 %v28_v43, %v28_v43  ;;  %v526_v50 = vpack.c.bf16 %v30_v49, %v29_v48  ;;  %v198_v52 = vmul.f32 %v29_v48, %v29_v48  ;;  %s336_s23 = sshll.u32 %s602_s1, 4  ;;  %s337_s23 = int_to_ptr.vmem [resolvable:$true] %s336_s23 }
   0xe   :  { %498 = vmatprep.subr.msk.bf16.mxu0 %vm634_vm1, %v496_v18  ;;  %539 = vmatpush3.bf16.xpose.msk.msra.mxu1 %vm634_vm1, %v537_v19  ;;  %v553_v45 = vpack.c.bf16 %v195_v41, %v194_v40  ;;  %v199_v53 = vmul.f32 %v30_v49, %v30_v49  ;;  %v601_v56 = vmov 1.0   ;;  %s573_s24 = scalar_lea.vmem %s337_s23, 16  ;;  %s577_s25 = scalar_lea.vmem %s337_s23, 32 }
   0xf   :  { %540 = vmatprep.subr.bf16.mxu1 %v597_v8  ;;  %172 = vperm.xlu0 %570, %v34_v21   ;;  %v557_v51 = vpack.c.bf16 %v197_v47, %v196_v46  ;;  %p574_p0 = scmp.ne.s32.totalorder %s337_s23, %s573_s24  ;;  %p578_p1 = scmp.lt.s32.totalorder %s337_s23, %s337_s23 }
  0x10   :  { %v561_v54 = vpack.c.bf16 %v199_v53, %v198_v52  ;;  %p579_p2 = scmp.lt.s32.totalorder %s577_s25, %s573_s24 }
  0x12   :  { %p580_p3 = por %p579_p2, %p578_p1 }
  0x14   :  { %p581_p4 = pnand %p580_p3, %p574_p0 }
  0x15   :  { %501 = vmatpush3.bf16.xpose.msk.msra.mxu0 %vm634_vm1, %v496_v18 }
  0x16   :  { %504 = vmatprep.subr.msk.bf16.mxu0 %vm634_vm1, %v502_v26  ;;  %543 = vmatpush3.bf16.xpose.msk.msra.mxu1 %vm634_vm1, %v541_v27 }
  0x17   :  { %544 = vmatprep.subr.bf16.mxu1 %v597_v8 }
  0x1d   :  { %507 = vmatpush3.bf16.xpose.msk.msra.mxu0 %vm634_vm1, %v502_v26 }
  0x1e   :  { %510 = vmatprep.subr.msk.bf16.mxu0 %vm634_vm1, %v508_v32  ;;  %547 = vmatpush3.bf16.xpose.msk.msra.mxu1 %vm634_vm1, %v545_v33 }
  0x1f   :  { %548 = vmatprep.subr.bf16.mxu1 %v597_v8 }
  0x25   :  { %513 = vmatpush3.bf16.xpose.msk.msra.mxu0 %vm634_vm1, %v508_v32 }
  0x26   :  { %516 = vmatprep.subr.msk.bf16.mxu0 %vm634_vm1, %v514_v38  ;;  %551 = vmatpush3.bf16.xpose.msk.msra.mxu1 %vm634_vm1, %v549_v39 }
  0x27   :  { %552 = vmatprep.subr.bf16.mxu1 %v597_v8 }
  0x2d   :  { %519 = vmatpush3.bf16.xpose.msk.msra.mxu0 %vm634_vm1, %v514_v38 }
  0x2e   :  { %522 = vmatprep.subr.msk.bf16.mxu0 %vm634_vm1, %v520_v44  ;;  %555 = vmatpush3.bf16.xpose.msk.msra.mxu1 %vm634_vm1, %v553_v45 }
  0x2f   :  { %556 = vmatprep.subr.bf16.mxu1 %v597_v8 }
  0x35   :  { %525 = vmatpush3.bf16.xpose.msk.msra.mxu0 %vm634_vm1, %v520_v44 }
  0x36   :  { %528 = vmatprep.subr.msk.bf16.mxu0 %vm634_vm1, %v526_v50  ;;  %559 = vmatpush3.bf16.xpose.msk.msra.mxu1 %vm634_vm1, %v557_v51 }
  0x37   :  { %560 = vmatprep.subr.bf16.mxu1 %v597_v8 }
  0x3d   :  { %531 = vmatpush3.bf16.xpose.msk.msra.mxu0 %vm634_vm1, %v526_v50 }
  0x3e   :  { %563 = vmatpush3.bf16.xpose.msk.msra.mxu1 %vm634_vm1, %v561_v54 }
  0x44   :  { %447 = vmatmul.mubr.msk.f32.vlgmr.msra.gmra.mrb[0].mxu0 %vm35_vm0, %v32_v55 }
  0x45   :  { %482 = vmatmul.mubr.msk.f32.vlgmr.msra.gmra.mrb[0].mxu1 %vm35_vm0, %v601_v56 }
  0x8a   :  { %v168_v57 = vpop.permute.xlu0 %167 }
  0x8e   :  { %v173_v58 = vpop.permute.xlu0 %172 }
 0x117   :  { %v448_v59 = vpop.f32.mrb[0].mxu0 }
 0x118   :  { %v176_v60 = vadd.f32 %v448_v59, %v173_v58  ;;  %v156_v61 = vpop.f32.mrb[1].mxu0  ;;  %v317_v62 = vpop.f32.mrb[0].mxu1 }
 0x119   :  { %v175_v63 = vadd.f32 %v168_v57, %v156_v61  ;;  %v483_v0 = vpop.f32.mrb[1].mxu1 }
 0x11b   :  { %v177_v1 = vmin.f32 %v175_v63, %v176_v60 }
 0x11d   :  { %v178_v2 = vrot.slane %v177_v1, 4 }
 0x11f   :  { %v179_v3 = vmin.f32 %v177_v1, %v178_v2 }
 0x121   :  { %v180_v4 = vrot.slane %v179_v3, 2 }
 0x123   :  { %v181_v5 = vmin.f32 %v179_v3, %v180_v4 }
 0x125   :  { %v182_v6 = vrot.slane %v181_v5, 1 }
 0x127   :  { %v183_v7 = vmin.f32 %v181_v5, %v182_v6 }
 0x129   :  { %v318_v8 = vadd.f32 %v317_v62, %v183_v7 }
 0x12b   :  { %v321_v9 = vmax.f32 %v318_v8, 0.0 }
 0x12d   :  { %571 = vrsqrt.f32 %v321_v9  ;;  %vm324_vm3 = vcmp.eq.f32.partialorder %v321_v9, inf  ;;  %v327_v12 = vand.u32 2147483648, %v321_v9  ;;  %vm326_vm4 = vcmp.eq.f32.partialorder %v321_v9, 0.0 }
 0x137   :  { %v572_v10 = vpop.eup %571 }
 0x138   :  { %v323_v11 = vmul.f32 %v572_v10, %v321_v9 }
 0x13a   :  { %v325_v13 = vsel %vm324_vm3, %v321_v9, %v323_v11 }
 0x13b   :  { %v328_v14 = vsel %vm326_vm4, %v327_v12, %v325_v13 }
 0x13c   :  { %329 = vst [vmem:[#allocation2] sm:$0x1] %v328_v14 }
 0x13d   :  { %584 = shalt.err (!%p581_p4)
}
 0x13e   :  { %s585_s28 = scalar_lea.hbm %s763_s3, 16 }
 0x13f   :  { %p586_p5 = scmp.ne.s32.totalorder %s763_s3, %s585_s28  ;;  %p589_p6 = scmp.lt.u32.totalorder %s585_s28, %s763_s3 }
 0x141   :  { %p591_p7 = pnand %p589_p6, %p586_p5 }
 0x143   :  { %594 = shalt.err (!%p591_p7)
}
 0x144   :  { %339 = dma.vmem_to_hbm [thread:$0]  %s337_s23, 16, %s763_s3, [#allocation3]  }
 0x145   :  { %595 = dma.done.wait [#allocation3], 16  }
 0x146   :  { %596 = vsyncadd [#allocation3], 4294967280 }
 0x147   :  { %343 = vsyncpa [#allocation3], 1 }

</bundles_post_ra>
